<compile_context>
chip_gen: v7x
topology: tpu7x:2x2x1
jax: 0.10.0
libtpu: 0.0.40
codegen_flags: <defaults>
</compile_context>

<pallas_src>
import jax
import jax.numpy as jnp
from jax.experimental import pallas as pl
from jax.experimental.pallas import tpu as pltpu

LN_EPS = 1e-5


def critic_kernel(
    obs_ref, act_ref,
    # pre_fc: Linear + LayerNorm
    w0_ref, b0_ref, g_ref, beta_ref,
    # fused twin-Q weights
    wh_ref, wa_ref, bq0_ref, w1_ref, bq1_ref, w2_ref, bq2_ref,
    # output: (TILE_B, 2) -> [q1 | q2]
    q_out_ref,
):
    obs = obs_ref[...]
    act = act_ref[...]

    # pre_fc: Linear(repr_dim -> feature_dim)
    h = jnp.dot(obs, w0_ref[...], preferred_element_type=jnp.float32) + b0_ref[...]

    # LayerNorm over the feature axis (biased variance, eps=1e-5, affine)
    inv_f = 1.0 / h.shape[-1]
    mean = jnp.sum(h, axis=-1, keepdims=True) * inv_f
    cent = h - mean
    var = jnp.sum(cent * cent, axis=-1, keepdims=True) * inv_f
    h = cent * jax.lax.rsqrt(var + LN_EPS) * g_ref[...] + beta_ref[...]

    # Fused twin-Q MLP (hidden_depth=2):
    #   layer0: Linear(cat([h, act])) for both Qs  (split dot == concat dot)
    x = (jnp.dot(h, wh_ref[...], preferred_element_type=jnp.float32)
         + jnp.dot(act, wa_ref[...], preferred_element_type=jnp.float32)
         + bq0_ref[...])
    x = jnp.maximum(x, 0.0)
    #   layer1: block-diagonal (2H, 2H) keeps the two Q streams independent
    x = jnp.dot(x, w1_ref[...], preferred_element_type=jnp.float32) + bq1_ref[...]
    x = jnp.maximum(x, 0.0)
    #   layer2: (2H, 2) -> lane 0 = q1, lane 1 = q2  (lane-dense output)
    q_out_ref[...] = (jnp.dot(x, w2_ref[...], preferred_element_type=jnp.float32)
                      + bq2_ref[...])


def init_params(key, repr_dim, feature_dim, action_dim, hidden_dim):
    """Deterministic synthetic parameters (weights as [in, out])."""
    ks = jax.random.split(key, 3)
    scale = 0.1

    def lin(k, fan_in, fan_out):
        w = scale * jax.random.normal(k, (fan_in, fan_out), jnp.float32)
        b = jnp.zeros((1, fan_out), jnp.float32)
        return w, b

    w0, b0 = lin(ks[0], repr_dim, feature_dim)
    gamma = jnp.ones((1, feature_dim), jnp.float32)
    beta = jnp.zeros((1, feature_dim), jnp.float32)

    def q_net(k_base):
        kk = jax.random.split(k_base, 4)
        wh = scale * jax.random.normal(kk[0], (feature_dim, hidden_dim), jnp.float32)
        wa = scale * jax.random.normal(kk[1], (action_dim, hidden_dim), jnp.float32)
        b0_ = jnp.zeros((1, hidden_dim), jnp.float32)
        w1, b1 = lin(kk[2], hidden_dim, hidden_dim)
        w2, b2 = lin(kk[3], hidden_dim, 1)
        return (wh, wa, b0_, w1, b1, w2, b2)

    q1 = q_net(ks[1])
    q2 = q_net(ks[2])
    return (w0, b0, gamma, beta) + q1 + q2


def pack_params(params):
    """Fuse the two Q heads into wide / block-diagonal weights (done once)."""
    (w0, b0, g, beta,
     q1wh, q1wa, q1b0, q1w1, q1b1, q1w2, q1b2,
     q2wh, q2wa, q2b0, q2w1, q2b1, q2w2, q2b2) = params
    H = q1w1.shape[0]
    zHH = jnp.zeros((H, H), jnp.float32)
    zH1 = jnp.zeros((H, 1), jnp.float32)
    wh = jnp.concatenate([q1wh, q2wh], axis=1)                 # (feat, 2H)
    wa = jnp.concatenate([q1wa, q2wa], axis=1)                 # (act, 2H)
    bq0 = jnp.concatenate([q1b0, q2b0], axis=1)                # (1, 2H)
    w1 = jnp.block([[q1w1, zHH], [zHH, q2w1]])                 # (2H, 2H)
    bq1 = jnp.concatenate([q1b1, q2b1], axis=1)                # (1, 2H)
    w2 = jnp.block([[q1w2, zH1], [zH1, q2w2]])                 # (2H, 2)
    bq2 = jnp.concatenate([q1b2, q2b2], axis=1)                # (1, 2)
    return (w0, b0, g, beta, wh, wa, bq0, w1, bq1, w2, bq2)


def critic_forward(obs, action, packed):
    B, repr_dim = obs.shape
    action_dim = action.shape[1]
    (w0, b0, g, beta, wh, wa, bq0, w1, bq1, w2, bq2) = packed
    feature_dim = w0.shape[1]
    H2 = wh.shape[1]

    # Batch tile: full batch if small, else 512 rows (multiple of 8).
    # Weights are tiny (<100 KiB) so VMEM budget is safe even on v7x (64 MiB).
    tile_b = B if B <= 512 else 512
    grid = (pl.cdiv(B, tile_b),)

    def row_spec(ncols):
        return pl.BlockSpec((tile_b, ncols), lambda i: (i, 0))

    def full_spec(arr):
        return pl.BlockSpec(arr.shape, lambda i: (0, 0))  # VMEM-resident weights

    weights = (w0, b0, g, beta, wh, wa, bq0, w1, bq1, w2, bq2)
    in_specs = [row_spec(repr_dim), row_spec(action_dim)] + [full_spec(w) for w in weights]
    out_specs = row_spec(2)

    flops = 2 * B * (repr_dim * feature_dim
                     + (feature_dim + action_dim) * H2
                     + H2 * H2 + H2 * 2)
    bytes_accessed = 4 * (obs.size + action.size
                          + sum(int(w.size) for w in weights) + B * 2)
    cost = pl.CostEstimate(flops=flops, transcendentals=B,
                           bytes_accessed=bytes_accessed)

    q_both = pl.pallas_call(
        critic_kernel,
        out_shape=jax.ShapeDtypeStruct((B, 2), jnp.float32),
        grid=grid,
        in_specs=in_specs,
        out_specs=out_specs,
        compiler_params=pltpu.CompilerParams(dimension_semantics=("parallel",)),
        cost_estimate=cost,
    )(obs, action, *weights)

    # TODO(synk): optional bf16 weight/activation cast (f32 accumulation) for
    # v6e/v7x MXU throughput; kept f32 here to hold the 1e-4 tolerance.
    return q_both[:, 0:1], q_both[:, 1:2]


def critic_reference(obs, action, params):
    (w0, b0, g, beta,
     q1wh, q1wa, q1b0, q1w1, q1b1, q1w2, q1b2,
     q2wh, q2wa, q2b0, q2w1, q2b1, q2w2, q2b2) = params
    h = obs @ w0 + b0
    mean = jnp.mean(h, axis=-1, keepdims=True)
    var = jnp.mean((h - mean) ** 2, axis=-1, keepdims=True)
    h = (h - mean) / jnp.sqrt(var + LN_EPS) * g + beta
    ha = jnp.concatenate([h, action], axis=-1)

    def q_net(wh, wa, b0_, w1, b1, w2, b2):
        wcat = jnp.concatenate([wh, wa], axis=0)
        x = jnp.maximum(ha @ wcat + b0_, 0.0)
        x = jnp.maximum(x @ w1 + b1, 0.0)
        return x @ w2 + b2

    return (q_net(q1wh, q1wa, q1b0, q1w1, q1b1, q1w2, q1b2),
            q_net(q2wh, q2wa, q2b0, q2w1, q2b1, q2w2, q2b2))


if __name__ == "__main__":
    # Small shapes consistent with Critic(repr_dim, feature_dim, action_shape,
    # hidden_dim, hidden_depth=2)
    B, repr_dim, feature_dim, action_dim, hidden_dim = 8, 32, 16, 4, 32

    key = jax.random.PRNGKey(0)
    k_obs, k_act, k_par = jax.random.split(key, 3)
    obs = jax.random.normal(k_obs, (B, repr_dim), jnp.float32)
    action = jax.random.normal(k_act, (B, action_dim), jnp.float32)
    params = init_params(k_par, repr_dim, feature_dim, action_dim, hidden_dim)
    packed = pack_params(params)

    q1, q2 = critic_forward(obs, action, packed)
    jax.block_until_ready((q1, q2))

    r1, r2 = critic_reference(obs, action, params)
    assert q1.shape == (B, 1) and q2.shape == (B, 1)
    assert jnp.allclose(q1, r1, atol=1e-4, rtol=1e-4)
    assert jnp.allclose(q2, r2, atol=1e-4, rtol=1e-4)

    print("KERNEL_OK")
</pallas_src>

<mosaic_0001>
module attributes {stable_mosaic.version = 11 : i64} {
  func.func @critic_kernel(%arg0: i32, %arg1: memref<8x32xf32, #tpu.memory_space<vmem>>, %arg2: memref<8x4xf32, #tpu.memory_space<vmem>>, %arg3: memref<32x16xf32, #tpu.memory_space<vmem>>, %arg4: memref<1x16xf32, #tpu.memory_space<vmem>>, %arg5: memref<1x16xf32, #tpu.memory_space<vmem>>, %arg6: memref<1x16xf32, #tpu.memory_space<vmem>>, %arg7: memref<16x64xf32, #tpu.memory_space<vmem>>, %arg8: memref<4x64xf32, #tpu.memory_space<vmem>>, %arg9: memref<1x64xf32, #tpu.memory_space<vmem>>, %arg10: memref<64x64xf32, #tpu.memory_space<vmem>>, %arg11: memref<1x64xf32, #tpu.memory_space<vmem>>, %arg12: memref<64x2xf32, #tpu.memory_space<vmem>>, %arg13: memref<1x2xf32, #tpu.memory_space<vmem>>, %arg14: memref<8x2xf32, #tpu.memory_space<vmem>>) attributes {dimension_semantics = [#tpu.dimension_semantics<parallel>], iteration_bounds = array<i64: 1>, scalar_prefetch = 0 : i64, scratch_operands = 0 : i64, tpu.core_type = #tpu.core_type<tc>, window_params = [{transform_indices = @transform_0, window_bounds = array<i64: 8, 32>}, {transform_indices = @transform_1, window_bounds = array<i64: 8, 4>}, {pipeline_mode = #tpu.pipeline_mode<synchronous>, transform_indices = @transform_2, window_bounds = array<i64: 32, 16>}, {pipeline_mode = #tpu.pipeline_mode<synchronous>, transform_indices = @transform_3, window_bounds = array<i64: 1, 16>}, {pipeline_mode = #tpu.pipeline_mode<synchronous>, transform_indices = @transform_4, window_bounds = array<i64: 1, 16>}, {pipeline_mode = #tpu.pipeline_mode<synchronous>, transform_indices = @transform_5, window_bounds = array<i64: 1, 16>}, {pipeline_mode = #tpu.pipeline_mode<synchronous>, transform_indices = @transform_6, window_bounds = array<i64: 16, 64>}, {pipeline_mode = #tpu.pipeline_mode<synchronous>, transform_indices = @transform_7, window_bounds = array<i64: 4, 64>}, {pipeline_mode = #tpu.pipeline_mode<synchronous>, transform_indices = @transform_8, window_bounds = array<i64: 1, 64>}, {pipeline_mode = #tpu.pipeline_mode<synchronous>, transform_indices = @transform_9, window_bounds = array<i64: 64, 64>}, {pipeline_mode = #tpu.pipeline_mode<synchronous>, transform_indices = @transform_10, window_bounds = array<i64: 1, 64>}, {pipeline_mode = #tpu.pipeline_mode<synchronous>, transform_indices = @transform_11, window_bounds = array<i64: 64, 2>}, {pipeline_mode = #tpu.pipeline_mode<synchronous>, transform_indices = @transform_12, window_bounds = array<i64: 1, 2>}, {transform_indices = @transform_13, window_bounds = array<i64: 8, 2>}]} {
    %c0 = arith.constant 0 : index
    %c0_0 = arith.constant 0 : index
    %0 = vector.load %arg1[%c0, %c0_0] : memref<8x32xf32, #tpu.memory_space<vmem>>, vector<8x32xf32>
    %c0_1 = arith.constant 0 : index
    %c0_2 = arith.constant 0 : index
    %1 = vector.load %arg2[%c0_1, %c0_2] : memref<8x4xf32, #tpu.memory_space<vmem>>, vector<8x4xf32>
    %c0_3 = arith.constant 0 : index
    %c0_4 = arith.constant 0 : index
    %2 = vector.load %arg3[%c0_3, %c0_4] : memref<32x16xf32, #tpu.memory_space<vmem>>, vector<32x16xf32>
    %cst = arith.constant dense<0.000000e+00> : vector<8x16xf32>
    %3 = tpu.matmul %0, %2, %cst {dimension_numbers = #tpu.dot_dimension_numbers<[1], [0], [0], [1], [0, 0, 1, 1], [], []>} : vector<8x32xf32>, vector<32x16xf32>, vector<8x16xf32> -> vector<8x16xf32>
    %c0_5 = arith.constant 0 : index
    %c0_6 = arith.constant 0 : index
    %4 = vector.load %arg4[%c0_5, %c0_6] : memref<1x16xf32, #tpu.memory_space<vmem>>, vector<1x16xf32>
    %5 = vector.broadcast %4 : vector<1x16xf32> to vector<8x16xf32>
    %6 = arith.addf %3, %5 : vector<8x16xf32>
    %cst_7 = arith.constant dense<0.000000e+00> : vector<8xf32>
    %7 = vector.multi_reduction <add>, %6, %cst_7 [1] : vector<8x16xf32> to vector<8xf32>
    %8 = vector.shape_cast %7 : vector<8xf32> to vector<8x1xf32>
    %cst_8 = arith.constant 6.250000e-02 : f32
    %9 = vector.broadcast %cst_8 : f32 to vector<8x1xf32>
    %10 = arith.mulf %8, %9 : vector<8x1xf32>
    %11 = vector.broadcast %10 : vector<8x1xf32> to vector<8x16xf32>
    %12 = arith.subf %6, %11 : vector<8x16xf32>
    %13 = arith.mulf %12, %12 : vector<8x16xf32>
    %cst_9 = arith.constant dense<0.000000e+00> : vector<8xf32>
    %14 = vector.multi_reduction <add>, %13, %cst_9 [1] : vector<8x16xf32> to vector<8xf32>
    %15 = vector.shape_cast %14 : vector<8xf32> to vector<8x1xf32>
    %cst_10 = arith.constant 6.250000e-02 : f32
    %16 = vector.broadcast %cst_10 : f32 to vector<8x1xf32>
    %17 = arith.mulf %15, %16 : vector<8x1xf32>
    %cst_11 = arith.constant 9.99999974E-6 : f32
    %18 = vector.broadcast %cst_11 : f32 to vector<8x1xf32>
    %19 = arith.addf %17, %18 : vector<8x1xf32>
    %20 = math.rsqrt %19 : vector<8x1xf32>
    %21 = vector.broadcast %20 : vector<8x1xf32> to vector<8x16xf32>
    %22 = arith.mulf %12, %21 : vector<8x16xf32>
    %c0_12 = arith.constant 0 : index
    %c0_13 = arith.constant 0 : index
    %23 = vector.load %arg5[%c0_12, %c0_13] : memref<1x16xf32, #tpu.memory_space<vmem>>, vector<1x16xf32>
    %24 = vector.broadcast %23 : vector<1x16xf32> to vector<8x16xf32>
    %25 = arith.mulf %22, %24 : vector<8x16xf32>
    %c0_14 = arith.constant 0 : index
    %c0_15 = arith.constant 0 : index
    %26 = vector.load %arg6[%c0_14, %c0_15] : memref<1x16xf32, #tpu.memory_space<vmem>>, vector<1x16xf32>
    %27 = vector.broadcast %26 : vector<1x16xf32> to vector<8x16xf32>
    %28 = arith.addf %25, %27 : vector<8x16xf32>
    %c0_16 = arith.constant 0 : index
    %c0_17 = arith.constant 0 : index
    %29 = vector.load %arg7[%c0_16, %c0_17] : memref<16x64xf32, #tpu.memory_space<vmem>>, vector<16x64xf32>
    %cst_18 = arith.constant dense<0.000000e+00> : vector<8x64xf32>
    %30 = tpu.matmul %28, %29, %cst_18 {dimension_numbers = #tpu.dot_dimension_numbers<[1], [0], [0], [1], [0, 0, 1, 1], [], []>} : vector<8x16xf32>, vector<16x64xf32>, vector<8x64xf32> -> vector<8x64xf32>
    %c0_19 = arith.constant 0 : index
    %c0_20 = arith.constant 0 : index
    %31 = vector.load %arg8[%c0_19, %c0_20] : memref<4x64xf32, #tpu.memory_space<vmem>>, vector<4x64xf32>
    %cst_21 = arith.constant dense<0.000000e+00> : vector<8x64xf32>
    %32 = tpu.matmul %1, %31, %cst_21 {dimension_numbers = #tpu.dot_dimension_numbers<[1], [0], [0], [1], [0, 0, 1, 1], [], []>} : vector<8x4xf32>, vector<4x64xf32>, vector<8x64xf32> -> vector<8x64xf32>
    %33 = arith.addf %30, %32 : vector<8x64xf32>
    %c0_22 = arith.constant 0 : index
    %c0_23 = arith.constant 0 : index
    %34 = vector.load %arg9[%c0_22, %c0_23] : memref<1x64xf32, #tpu.memory_space<vmem>>, vector<1x64xf32>
    %35 = vector.broadcast %34 : vector<1x64xf32> to vector<8x64xf32>
    %36 = arith.addf %33, %35 : vector<8x64xf32>
    %cst_24 = arith.constant 0.000000e+00 : f32
    %37 = vector.broadcast %cst_24 : f32 to vector<8x64xf32>
    %38 = arith.maximumf %36, %37 : vector<8x64xf32>
    %c0_25 = arith.constant 0 : index
    %c0_26 = arith.constant 0 : index
    %39 = vector.load %arg10[%c0_25, %c0_26] : memref<64x64xf32, #tpu.memory_space<vmem>>, vector<64x64xf32>
    %cst_27 = arith.constant dense<0.000000e+00> : vector<8x64xf32>
    %40 = tpu.matmul %38, %39, %cst_27 {dimension_numbers = #tpu.dot_dimension_numbers<[1], [0], [0], [1], [0, 0, 1, 1], [], []>} : vector<8x64xf32>, vector<64x64xf32>, vector<8x64xf32> -> vector<8x64xf32>
    %c0_28 = arith.constant 0 : index
    %c0_29 = arith.constant 0 : index
    %41 = vector.load %arg11[%c0_28, %c0_29] : memref<1x64xf32, #tpu.memory_space<vmem>>, vector<1x64xf32>
    %42 = vector.broadcast %41 : vector<1x64xf32> to vector<8x64xf32>
    %43 = arith.addf %40, %42 : vector<8x64xf32>
    %cst_30 = arith.constant 0.000000e+00 : f32
    %44 = vector.broadcast %cst_30 : f32 to vector<8x64xf32>
    %45 = arith.maximumf %43, %44 : vector<8x64xf32>
    %c0_31 = arith.constant 0 : index
    %c0_32 = arith.constant 0 : index
    %46 = vector.load %arg12[%c0_31, %c0_32] : memref<64x2xf32, #tpu.memory_space<vmem>>, vector<64x2xf32>
    %cst_33 = arith.constant dense<0.000000e+00> : vector<8x2xf32>
    %47 = tpu.matmul %45, %46, %cst_33 {dimension_numbers = #tpu.dot_dimension_numbers<[1], [0], [0], [1], [0, 0, 1, 1], [], []>} : vector<8x64xf32>, vector<64x2xf32>, vector<8x2xf32> -> vector<8x2xf32>
    %c0_34 = arith.constant 0 : index
    %c0_35 = arith.constant 0 : index
    %48 = vector.load %arg13[%c0_34, %c0_35] : memref<1x2xf32, #tpu.memory_space<vmem>>, vector<1x2xf32>
    %49 = vector.broadcast %48 : vector<1x2xf32> to vector<8x2xf32>
    %50 = arith.addf %47, %49 : vector<8x2xf32>
    %c0_36 = arith.constant 0 : index
    %c0_37 = arith.constant 0 : index
    %51 = vector.load %arg14[%c0_36, %c0_37] : memref<8x2xf32, #tpu.memory_space<vmem>>, vector<8x2xf32>
    tpu.vector_store %arg14[%c0_36, %c0_37], %50 {strides = array<i32>} : memref<8x2xf32, #tpu.memory_space<vmem>>, vector<8x2xf32>,
    return
  }
  func.func @transform_0(%arg0: i32) -> (i32, i32) {
    %c0_i32 = arith.constant 0 : i32
    %c0_i32_0 = arith.constant 0 : i32
    return %arg0, %c0_i32 : i32, i32
  }
  func.func @transform_1(%arg0: i32) -> (i32, i32) {
    %c0_i32 = arith.constant 0 : i32
    %c0_i32_0 = arith.constant 0 : i32
    return %arg0, %c0_i32 : i32, i32
  }
  func.func @transform_2(%arg0: i32) -> (i32, i32) {
    %c0_i32 = arith.constant 0 : i32
    %c0_i32_0 = arith.constant 0 : i32
    %c0_i32_1 = arith.constant 0 : i32
    return %c0_i32, %c0_i32_0 : i32, i32
  }
  func.func @transform_3(%arg0: i32) -> (i32, i32) {
    %c0_i32 = arith.constant 0 : i32
    %c0_i32_0 = arith.constant 0 : i32
    %c0_i32_1 = arith.constant 0 : i32
    return %c0_i32, %c0_i32_0 : i32, i32
  }
  func.func @transform_4(%arg0: i32) -> (i32, i32) {
    %c0_i32 = arith.constant 0 : i32
    %c0_i32_0 = arith.constant 0 : i32
    %c0_i32_1 = arith.constant 0 : i32
    return %c0_i32, %c0_i32_0 : i32, i32
  }
  func.func @transform_5(%arg0: i32) -> (i32, i32) {
    %c0_i32 = arith.constant 0 : i32
    %c0_i32_0 = arith.constant 0 : i32
    %c0_i32_1 = arith.constant 0 : i32
    return %c0_i32, %c0_i32_0 : i32, i32
  }
  func.func @transform_6(%arg0: i32) -> (i32, i32) {
    %c0_i32 = arith.constant 0 : i32
    %c0_i32_0 = arith.constant 0 : i32
    %c0_i32_1 = arith.constant 0 : i32
    return %c0_i32, %c0_i32_0 : i32, i32
  }
  func.func @transform_7(%arg0: i32) -> (i32, i32) {
    %c0_i32 = arith.constant 0 : i32
    %c0_i32_0 = arith.constant 0 : i32
    %c0_i32_1 = arith.constant 0 : i32
    return %c0_i32, %c0_i32_0 : i32, i32
  }
  func.func @transform_8(%arg0: i32) -> (i32, i32) {
    %c0_i32 = arith.constant 0 : i32
    %c0_i32_0 = arith.constant 0 : i32
    %c0_i32_1 = arith.constant 0 : i32
    return %c0_i32, %c0_i32_0 : i32, i32
  }
  func.func @transform_9(%arg0: i32) -> (i32, i32) {
    %c0_i32 = arith.constant 0 : i32
    %c0_i32_0 = arith.constant 0 : i32
    %c0_i32_1 = arith.constant 0 : i32
    return %c0_i32, %c0_i32_0 : i32, i32
  }
  func.func @transform_10(%arg0: i32) -> (i32, i32) {
    %c0_i32 = arith.constant 0 : i32
    %c0_i32_0 = arith.constant 0 : i32
    %c0_i32_1 = arith.constant 0 : i32
    return %c0_i32, %c0_i32_0 : i32, i32
  }
  func.func @transform_11(%arg0: i32) -> (i32, i32) {
    %c0_i32 = arith.constant 0 : i32
    %c0_i32_0 = arith.constant 0 : i32
    %c0_i32_1 = arith.constant 0 : i32
    return %c0_i32, %c0_i32_0 : i32, i32
  }
  func.func @transform_12(%arg0: i32) -> (i32, i32) {
    %c0_i32 = arith.constant 0 : i32
    %c0_i32_0 = arith.constant 0 : i32
    %c0_i32_1 = arith.constant 0 : i32
    return %c0_i32, %c0_i32_0 : i32, i32
  }
  func.func @transform_13(%arg0: i32) -> (i32, i32) {
    %c0_i32 = arith.constant 0 : i32
    %c0_i32_0 = arith.constant 0 : i32
    return %arg0, %c0_i32 : i32, i32
  }
}

</mosaic_0001>

<bundles_post_ra>
// kernel: tpu_custom_call.1
= control target key start
LH: loop header
LB: loop body
LE: loop exit
PB: predicated region body
PF: predicated region fallthrough
CT: control target
= control target key end

     0   :  { %v647_v0 = vmov 0.0|0.0   ;;  %vm648_vm0 = vmmov 0   ;;  %v649_v4 = vmov 0.0   ;;  %vm57_vm1 = vcmask 261120   ;;  %s841_s2 = inlined_call_operand.vmem [shape: f32[32,16], index: 2, kind: input, shape index: {}]   ;;  %s842_s0 = inlined_call_operand.vmem [shape: f32[8,32], index: 0, kind: input, shape index: {}]   ;;  %s843_s3 = inlined_call_operand.vmem [shape: f32[1,16], index: 3, kind: input, shape index: {}]   ;;  %s844_s7 = inlined_call_operand.vmem [shape: f32[4,64], index: 7, kind: input, shape index: {}]   ;;  %s845_s1 = inlined_call_operand.vmem [shape: f32[8,4], index: 1, kind: input, shape index: {}]   ;;  %s846_s6 = inlined_call_operand.vmem [shape: f32[16,64], index: 6, kind: input, shape index: {}]   ;;  %s847_s4 = inlined_call_operand.vmem [shape: f32[1,16], index: 4, kind: input, shape index: {}]   ;;  %s848_s9 = inlined_call_operand.vmem [shape: f32[64,64], index: 9, kind: input, shape index: {}]   ;;  %s849_s5 = inlined_call_operand.vmem [shape: f32[1,16], index: 5, kind: input, shape index: {}]   ;;  %s850_s11 = inlined_call_operand.vmem [shape: f32[64,2], index: 11, kind: input, shape index: {}]   ;;  %s851_s8 = inlined_call_operand.vmem [shape: f32[1,64], index: 8, kind: input, shape index: {}]   ;;  %s852_s10 = inlined_call_operand.vmem [shape: f32[1,64], index: 10, kind: input, shape index: {}]   ;;  %s853_s12 = inlined_call_operand.vmem [shape: f32[1,2], index: 12, kind: input, shape index: {}]   ;;  %s854_s13 = inlined_call_operand.vmem [shape: f32[8,2], index: 13, kind: output, shape index: {}]  }
   0x1   :  { %609 = vmatprep.subr.bf16.mxu0 %v647_v0  ;;  %v46_v1 = vld [vmem:[%s841_s2] sm:$0xff]  ;;  %v47_v2 = vld [vmem:[%s841_s2 + $0x8] sm:$0xff]  ;;  %v48_v3 = vld [vmem:[%s841_s2 + $0x10] sm:$0xff]  ;;  %556 = vmatprep.mubr.msk.f32.mxu0 %vm648_vm0, %v649_v4  ;;  %vm131_vm2 = vcmask 130048   ;;  %vm168_vm3 = vcmask 1043456   ;;  %vm164_vm4 = vcmask 31744  }
   0x2   :  { %v610_v5 = vpack.c.bf16 %v47_v2, %v46_v1  ;;  %v49_v6 = vld [vmem:[%s841_s2 + $0x18] sm:$0xff]  ;;  %559 = vmatprep.subr.mxu1 %v649_v4  ;;  %561 = vmatprep.mubr.msk.f32.mxu1 %vm648_vm0, %v649_v4  ;;  %v44_v8 = vld [vmem:[%s842_s0] sm:$0xff]  ;;  %v162_v22 = vld [vmem:[%s846_s6 + $0x8] sm:$0xff]  ;;  %vm339_vm5 = vcmask 523264   ;;  %vm502_vm6 = vcmask 15360  }
   0x3   :  { %v613_v7 = vpack.c.bf16 %v49_v6, %v48_v3  ;;  %v508_v9 = vld [vmem:[%s843_s3] ss:$0 sm:$0xff]  ;;  %v325_v31 = vld [vmem:[%s848_s9 + $0x8] sm:$0xff]  ;;  %v326_v36 = vld [vmem:[%s848_s9 + $0x10] sm:$0xff] }
   0x4   :  { %611 = vmatpush3.bf16.msra.mxu0 %v610_v5  ;;  %v163_v19 = vld [vmem:[%s844_s7] sm:$0xf]  ;;  %v327_v37 = vld [vmem:[%s848_s9 + $0x18] sm:$0xff]  ;;  %v329_v42 = vld [vmem:[%s848_s9 + $0x28] sm:$0xff] }
   0x5   :  { %612 = vmatprep.subr.bf16.mxu0 %v647_v0  ;;  %560 = vmatpush3.msk.msra.mxu1 %vm168_vm3, %v163_v19  ;;  %v45_v20 = vld [vmem:[%s845_s1] sm:$0xff]  ;;  %v622_v38 = vpack.c.bf16 %v327_v37, %v326_v36  ;;  %v330_v44 = vld [vmem:[%s848_s9 + $0x30] sm:$0xff]  ;;  %v331_v45 = vld [vmem:[%s848_s9 + $0x38] sm:$0xff] }
   0x6   :  { %v161_v21 = vld [vmem:[%s846_s6] sm:$0xff]  ;;  %562 = vmatmul.mubr.msk.f32.vlgmr.msra.gmra.mrb[0].mxu1 %vm164_vm4, %v45_v20  ;;  %615 = vmatprep.subr.bf16.mxu1 %v647_v0  ;;  %v628_v46 = vpack.c.bf16 %v331_v45, %v330_v44  ;;  %v415_v48 = vld [vmem:[%s850_s11 + $0x8] sm:$0xff]  ;;  %v416_v49 = vld [vmem:[%s850_s11 + $0x10] sm:$0xff] }
   0x7   :  { %v616_v23 = vpack.c.bf16 %v162_v22, %v161_v21  ;;  %568 = vmatprep.mubr.msk.f32.mxu1 %vm648_vm0, %v649_v4  ;;  %v510_v28 = vld [vmem:[%s847_s4] ss:$0 sm:$0xff]  ;;  %v417_v51 = vld [vmem:[%s850_s11 + $0x18] sm:$0xff]  ;;  %v419_v54 = vld [vmem:[%s850_s11 + $0x28] sm:$0xff] }
   0x8   :  { %614 = vmatpush3.bf16.msra.mxu0 %v613_v7  ;;  %v324_v30 = vld [vmem:[%s848_s9] sm:$0xff]  ;;  %v634_v52 = vpack.c.bf16 %v417_v51, %v416_v49  ;;  %v420_v62 = vld [vmem:[%s850_s11 + $0x30] sm:$0xff]  ;;  %v421_v63 = vld [vmem:[%s850_s11 + $0x38] sm:$0xff] }
   0x9   :  { %630 = vmatprep.subr.bf16.mxu0 %v647_v0  ;;  %617 = vmatpush3.bf16.msra.mxu1 %v616_v23  ;;  %v511_v32 = vld [vmem:[%s849_s5] ss:$0 sm:$0xff]  ;;  %v619_v34 = vpack.c.bf16 %v325_v31, %v324_v30 }
   0xa   :  { %618 = vmatprep.subr.bf16.mxu1 %v647_v0  ;;  %v328_v41 = vld [vmem:[%s848_s9 + $0x20] sm:$0xff] }
   0xb   :  { %557 = vmatmul.mubr.msk.f32.vlgmr.msra.gmra.mrb[0].mxu0 %vm57_vm1, %v44_v8  ;;  %v625_v43 = vpack.c.bf16 %v329_v42, %v328_v41  ;;  %v414_v47 = vld [vmem:[%s850_s11] sm:$0xff] }
   0xc   :  { %606 = vmatprep.mubr.msk.f32.mxu0 %vm648_vm0, %v649_v4  ;;  %v631_v50 = vpack.c.bf16 %v415_v48, %v414_v47  ;;  %v418_v53 = vld [vmem:[%s850_s11 + $0x20] sm:$0xff] }
   0xd   :  { %v637_v55 = vpack.c.bf16 %v419_v54, %v418_v53  ;;  %v515_v57 = vld [vmem:[%s851_s8] ss:$0 sm:$0xff] }
   0xe   :  { %632 = vmatpush3.bf16.msra.mxu0 %v631_v50  ;;  %v516_v1 = vld [vmem:[%s852_s10] ss:$0 sm:$0xff] }
   0xf   :  { %633 = vmatprep.subr.bf16.mxu0 %v647_v0  ;;  %v518_v6 = vld [vmem:[%s853_s12] ss:$0 sm:$0xff] }
  0x12   :  { %635 = vmatpush3.bf16.msra.mxu0 %v634_v52 }
  0x13   :  { %636 = vmatprep.subr.bf16.mxu0 %v647_v0 }
  0x16   :  { %638 = vmatpush3.bf16.msra.mxu0 %v637_v55 }
  0x17   :  { %639 = vmatprep.subr.bf16.mxu0 %v647_v0 }
  0xd9   :  { %v238_v39 = vpop.f32.mrb[0].mxu1 }
  0xda   :  { %v563_v40 = vpop.f32.mrb[1].mxu1 }
  0xde   :  { %v127_v10 = vpop.f32.mrb[0].mxu0 }
  0xdf   :  { %v128_v11 = vadd.f32 %v508_v9, %v127_v10  ;;  %v558_v12 = vpop.f32.mrb[1].mxu0 }
  0xe1   :  { %v132_v13 = vsel %vm131_vm2, %v128_v11, 0.0 }
  0xe2   :  { %133 = vadd.xlane.f32.xlu0 %v132_v13 }
 0x16f   :  { %v134_v14 = vpop.xlane.xlu0 %133 }
 0x170   :  { %v135_v15 = vmul.f32 0.0625, %v134_v14 }
 0x172   :  { %v136_v16 = vsub.f32 %v128_v11, %v135_v15 }
 0x174   :  { %v137_v17 = vmul.f32 %v136_v16, %v136_v16 }
 0x176   :  { %v138_v18 = vsel %vm131_vm2, %v137_v17, 0.0 }
 0x177   :  { %139 = vadd.xlane.f32.xlu0 %v138_v18 }
 0x204   :  { %v140_v24 = vpop.xlane.xlu0 %139 }
 0x205   :  { %v141_v25 = vmul.f32 0.0625, %v140_v24 }
 0x207   :  { %v142_v26 = vadd.f32 1e-05, %v141_v25 }
 0x209   :  { %645 = vrsqrt.f32 %v142_v26 }
 0x213   :  { %v646_v27 = vpop.eup %645 }
 0x214   :  { %v144_v29 = vmul.f32 %v646_v27, %v136_v16 }
 0x216   :  { %v152_v33 = vmul.f32 %v510_v28, %v144_v29 }
 0x218   :  { %v160_v35 = vadd.f32 %v511_v32, %v152_v33 }
 0x21a   :  { %569 = vmatmul.mubr.msk.f32.vlgmr.msra.gmra.mrb[2].mxu1 %vm131_vm2, %v160_v35 }
 0x21b   :  { %620 = vmatpush3.bf16.msra.mxu1 %v619_v34  ;;  %587 = vmatprep.mubr.msk.f32.mxu1 %vm648_vm0, %v649_v4 }
 0x21c   :  { %621 = vmatprep.subr.bf16.mxu1 %v647_v0 }
 0x21f   :  { %623 = vmatpush3.bf16.msra.mxu1 %v622_v38 }
 0x220   :  { %624 = vmatprep.subr.bf16.mxu1 %v647_v0 }
 0x223   :  { %626 = vmatpush3.bf16.msra.mxu1 %v625_v43 }
 0x224   :  { %627 = vmatprep.subr.bf16.mxu1 %v647_v0  ;;  %v640_v0 = vpack.c.bf16 %v421_v63, %v420_v62 }
 0x226   :  { %641 = vmatpush3.bf16.msra.mxu0 %v640_v0 }
 0x227   :  { %629 = vmatpush3.bf16.msra.mxu1 %v628_v46 }
 0x2ed   :  { %v311_v56 = vpop.f32.mrb[2].mxu1 }
 0x2ee   :  { %v312_v58 = vadd.f32 %v311_v56, %v238_v39  ;;  %v570_v59 = vpop.f32.mrb[3].mxu1 }
 0x2f0   :  { %v322_v60 = vadd.f32 %v515_v57, %v312_v58 }
 0x2f2   :  { %v323_v61 = vmax.f32 %v322_v60, 0.0 }
 0x2f4   :  { %588 = vmatmul.mubr.msk.f32.vlgmr.msra.gmra.mrb[4].mxu1 %vm339_vm5, %v323_v61 }
 0x3c7   :  { %v409_v2 = vpop.f32.mrb[4].mxu1 }
 0x3c8   :  { %v410_v3 = vadd.f32 %v516_v1, %v409_v2  ;;  %v589_v4 = vpop.f32.mrb[5].mxu1 }
 0x3ca   :  { %v413_v5 = vmax.f32 %v410_v3, 0.0 }
 0x3cc   :  { %607 = vmatmul.mubr.msk.f32.vlgmr.msra.gmra.mrb[2].mxu0 %vm339_vm5, %v413_v5 }
 0x49f   :  { %v498_v7 = vpop.f32.mrb[2].mxu0 }
 0x4a0   :  { %v499_v8 = vadd.f32 %v518_v6, %v498_v7  ;;  %v608_v9 = vpop.f32.mrb[3].mxu0 }
 0x4a2   :  { %503 = vst.msk [vmem:[%s854_s13] sm:$0xff] %vm502_vm6, %v499_v8 }

</bundles_post_ra>
